<compile_context>
chip_gen: v6e
topology: v6e:2x2x1
jax: 0.10.0
libtpu: 0.0.40
codegen_flags: <defaults>
</compile_context>

<pallas_src>
import numpy as np
import jax
import jax.numpy as jnp
from jax import lax
from jax.experimental import pallas as pl
from jax.experimental.pallas import tpu as pltpu


_OC = 3                                   # three fixed SRM output channels
_VMEM_LIMIT_BYTES = 48 * 1024 * 1024      # safe on v7x (64 MiB phys); raises v5e default
_VMEM_BLOCK_BUDGET = 32 * 1024 * 1024     # block-sizing budget, headroom under the limit


# ----------------------------------------------------------------------------
# Full (OC, inc, 5, 5) SRM bank -- used only by the pure-JAX reference.
# ----------------------------------------------------------------------------
def build_srm_kernel(inc: int = 3) -> jnp.ndarray:
    f1 = np.asarray(
        [[0, 0, 0, 0, 0],
         [0, -1, 2, -1, 0],
         [0, 2, -4, 2, 0],
         [0, -1, 2, -1, 0],
         [0, 0, 0, 0, 0]], dtype=np.float64) / 4.0
    f2 = np.asarray(
        [[-1, 2, -2, 2, -1],
         [2, -6, 8, -6, 2],
         [-2, 8, -12, 8, -2],
         [2, -6, 8, -6, 2],
         [-1, 2, -2, 2, -1]], dtype=np.float64) / 12.0
    f3 = np.asarray(
        [[0, 0, 0, 0, 0],
         [0, 0, 0, 0, 0],
         [0, 1, -2, 1, 0],
         [0, 0, 0, 0, 0],
         [0, 0, 0, 0, 0]], dtype=np.float64) / 2.0
    filters = np.stack([f1, f2, f3]).astype(np.float32)[:, None, :, :]  # (3,1,5,5)
    filters = np.repeat(filters, inc, axis=1)                           # (3,inc,5,5)
    return jnp.asarray(filters, dtype=jnp.float32)


# ----------------------------------------------------------------------------
# Pallas kernel.
#   x_ref  : VMEM [bb, C, H, W]      input block (native dtype)
#   o_ref  : VMEM f32[bb, 3, H, W]
#   xc_ref : VMEM f32[bb, H, W+4]    scratch: column-padded channel sum
#   h_ref  : VMEM f32[bb, H+4, W]    scratch: horizontal pass H (taps [0,1,-2,1,0])
#   d_ref  : VMEM f32[bb, H+4, W]    scratch: horizontal pass D (taps [1,0,-2,0,1])
# ----------------------------------------------------------------------------
def srm_kernel(x_ref, o_ref, xc_ref, h_ref, d_ref):
    bb, C, H, W = x_ref.shape

    # --- channel sum (SRM filters are identical across input channels) ------
    xsum = x_ref[:, 0, :, :].astype(jnp.float32)
    for c in range(1, C):
        xsum = xsum + x_ref[:, c, :, :].astype(jnp.float32)

    # --- column padding (padding=2 in W); zero ONLY the 2-wide border strips.
    # Re-zeroed every grid step on purpose: safe under megacore "parallel"
    # sharding (each core sees an arbitrary subset of steps).
    zcol = jnp.zeros((bb, H, 2), jnp.float32)
    xc_ref[:, :, 0:2] = zcol
    xc_ref[:, :, W + 2:W + 4] = zcol
    xc_ref[:, :, 2:2 + W] = xsum

    # --- shared horizontal 5-tap passes, integer taps, scaling deferred -----
    c0 = xc_ref[:, :, 0:W]
    c1 = xc_ref[:, :, 1:1 + W]
    c2 = xc_ref[:, :, 2:2 + W]
    c3 = xc_ref[:, :, 3:3 + W]
    c4 = xc_ref[:, :, 4:4 + W]
    t2 = c2 + c2
    h_int = (c1 + c3) - t2          # x * [0, 1, -2, 1, 0]
    d_int = (c0 + c4) - t2          # x * [1, 0, -2, 0, 1]

    # Row padding (padding=2 in H): H/D of the all-zero padded rows are zero,
    # so only the 2 top / 2 bottom rows of the scratches are zeroed.
    zrow = jnp.zeros((bb, 2, W), jnp.float32)
    h_ref[:, 0:2, :] = zrow
    h_ref[:, H + 2:H + 4, :] = zrow
    h_ref[:, 2:2 + H, :] = h_int
    d_ref[:, 0:2, :] = zrow
    d_ref[:, H + 2:H + 4, :] = zrow
    d_ref[:, 2:2 + H, :] = d_int

    # --- short vertical combines (lane-aligned loads, lane width = W) -------
    h0 = h_ref[:, 0:H, :]
    h1 = h_ref[:, 1:1 + H, :]
    h2 = h_ref[:, 2:2 + H, :]
    h3 = h_ref[:, 3:3 + H, :]
    h4 = h_ref[:, 4:4 + H, :]
    d0 = d_ref[:, 0:H, :]
    d1 = d_ref[:, 1:1 + H, :]
    d2 = d_ref[:, 2:2 + H, :]
    d3 = d_ref[:, 3:3 + H, :]
    d4 = d_ref[:, 4:4 + H, :]

    s_h13 = h1 + h3
    s_h04 = h0 + h4
    s_d13 = d1 + d3
    s_d04 = d0 + d4

    # f1 = -(1/4) v(x)v        : raw1 = H[y+1] - 2 H[y+2] + H[y+3]
    raw1 = s_h13 - (h2 + h2)
    # f2 = (1/12)(cH(x)v + cD(x)d), cH = [2,-6,8,-6,2], cD = [-1,2,-2,2,-1]
    raw2 = (2.0 * s_h04 - 6.0 * s_h13 + 8.0 * h2) \
         + (2.0 * s_d13 - s_d04 - (d2 + d2))
    # f3 = (1/2) e2(x)v        : raw3 = H[y+2]   (== h2)

    # --- deferred normalization fused with Hardtanh(-3, 3) ------------------
    o_ref[:, 0, :, :] = jnp.clip(raw1 * (-0.25), -3.0, 3.0).astype(o_ref.dtype)
    o_ref[:, 1, :, :] = jnp.clip(raw2 * (1.0 / 12.0), -3.0, 3.0).astype(o_ref.dtype)
    o_ref[:, 2, :, :] = jnp.clip(h2 * 0.5, -3.0, 3.0).astype(o_ref.dtype)


# ----------------------------------------------------------------------------
# Batch-block selection: largest divisor of B that (a) keeps >= 4 grid steps
# (>= 2 per TensorCore on v7x) when B allows, and (b) fits the VMEM budget.
# ----------------------------------------------------------------------------
def _pick_batch_block(B, C, H, W, in_dtype, budget_bytes=_VMEM_BLOCK_BUDGET):
    in_bytes = jnp.dtype(in_dtype).itemsize

    def vmem_bytes(bb):
        blk_in = 2 * bb * C * H * W * in_bytes               # double-buffered input
        blk_out = 2 * bb * _OC * H * W * 4                   # double-buffered output
        scratch = (bb * H * (W + 4) + 2 * bb * (H + 4) * W) * 4
        live = 8 * bb * H * W * 4                            # intermediate headroom
        return blk_in + blk_out + scratch + live

    min_steps = 4 if B >= 4 else B
    best = 1
    for bb in range(1, B + 1):
        if B % bb != 0:
            continue
        if B // bb < min_steps:
            continue
        if vmem_bytes(bb) > budget_bytes:
            continue
        best = max(best, bb)
    return best


# ----------------------------------------------------------------------------
# Wrapper.
# ----------------------------------------------------------------------------
def srm_conv2d_simple(x: jnp.ndarray, batch_block: int | None = None) -> jnp.ndarray:
    B, C, H, W = x.shape
    bb = _pick_batch_block(B, C, H, W, x.dtype) if batch_block is None else batch_block
    assert B % bb == 0, "batch_block must divide the batch size"

    return pl.pallas_call(
        srm_kernel,
        out_shape=jax.ShapeDtypeStruct((B, _OC, H, W), jnp.float32),
        grid=(B // bb,),
        in_specs=[pl.BlockSpec((bb, C, H, W), lambda i: (i, 0, 0, 0))],
        out_specs=pl.BlockSpec((bb, _OC, H, W), lambda i: (i, 0, 0, 0)),
        scratch_shapes=[
            pltpu.VMEM((bb, H, W + 4), jnp.float32),   # column-padded channel sum
            pltpu.VMEM((bb, H + 4, W), jnp.float32),   # horizontal pass H
            pltpu.VMEM((bb, H + 4, W), jnp.float32),   # horizontal pass D
        ],
        compiler_params=pltpu.CompilerParams(
            dimension_semantics=("parallel",),          # disjoint per-batch outputs
            vmem_limit_bytes=_VMEM_LIMIT_BYTES),
    )(x)


# ----------------------------------------------------------------------------
# Pure-JAX reference (for correctness check only).
# ----------------------------------------------------------------------------
def srm_conv2d_simple_ref(x, kernel_w):
    out = lax.conv_general_dilated(
        x.astype(jnp.float32), kernel_w.astype(jnp.float32),
        window_strides=(1, 1), padding=((2, 2), (2, 2)),
        dimension_numbers=("NCHW", "OIHW", "NCHW"))
    return jnp.clip(out, -3.0, 3.0)


if __name__ == "__main__":
    inc = 3
    B, H, W = 2, 16, 16

    key = jax.random.PRNGKey(0)
    x = jax.random.normal(key, (B, inc, H, W), dtype=jnp.float32) * 2.0

    out = jax.block_until_ready(srm_conv2d_simple(x))

    ref = srm_conv2d_simple_ref(x, build_srm_kernel(inc))
    # Slightly relaxed atol: the separable / deferred-scale accumulation order
    # differs from the dense f32 conv by a few hundred ulps at the +/-3 scale.
    np.testing.assert_allclose(np.asarray(out), np.asarray(ref),
                               atol=3e-5, rtol=1e-5)

    print("KERNEL_OK")
</pallas_src>

<mosaic_0001>
module attributes {stable_mosaic.version = 11 : i64} {
  func.func @srm_kernel(%arg0: i32, %arg1: memref<1x3x16x16xf32, #tpu.memory_space<vmem>>, %arg2: memref<1x3x16x16xf32, #tpu.memory_space<vmem>>, %arg3: memref<1x16x20xf32, #tpu.memory_space<vmem>>, %arg4: memref<1x20x16xf32, #tpu.memory_space<vmem>>, %arg5: memref<1x20x16xf32, #tpu.memory_space<vmem>>) attributes {dimension_semantics = [#tpu.dimension_semantics<parallel>], iteration_bounds = array<i64: 2>, scalar_prefetch = 0 : i64, scratch_operands = 3 : i64, tpu.core_type = #tpu.core_type<tc>, window_params = [{transform_indices = @transform_0, window_bounds = array<i64: 1, 3, 16, 16>}, {transform_indices = @transform_1, window_bounds = array<i64: 1, 3, 16, 16>}]} {
    %c0 = arith.constant 0 : index
    %c0_0 = arith.constant 0 : index
    %c0_1 = arith.constant 0 : index
    %c0_2 = arith.constant 0 : index
    %0 = vector.load %arg1[%c0, %c0_0, %c0_1, %c0_2] : memref<1x3x16x16xf32, #tpu.memory_space<vmem>>, vector<1x1x16x16xf32>
    %1 = vector.shape_cast %0 : vector<1x1x16x16xf32> to vector<1x16x16xf32>
    %c0_3 = arith.constant 0 : index
    %c1 = arith.constant 1 : index
    %c0_4 = arith.constant 0 : index
    %c0_5 = arith.constant 0 : index
    %2 = vector.load %arg1[%c0_3, %c1, %c0_4, %c0_5] : memref<1x3x16x16xf32, #tpu.memory_space<vmem>>, vector<1x1x16x16xf32>
    %3 = vector.shape_cast %2 : vector<1x1x16x16xf32> to vector<1x16x16xf32>
    %4 = arith.addf %1, %3 : vector<1x16x16xf32>
    %c0_6 = arith.constant 0 : index
    %c2 = arith.constant 2 : index
    %c0_7 = arith.constant 0 : index
    %c0_8 = arith.constant 0 : index
    %5 = vector.load %arg1[%c0_6, %c2, %c0_7, %c0_8] : memref<1x3x16x16xf32, #tpu.memory_space<vmem>>, vector<1x1x16x16xf32>
    %6 = vector.shape_cast %5 : vector<1x1x16x16xf32> to vector<1x16x16xf32>
    %7 = arith.addf %4, %6 : vector<1x16x16xf32>
    %cst = arith.constant 0.000000e+00 : f32
    %8 = vector.broadcast %cst : f32 to vector<1x16x2xf32>
    %c0_9 = arith.constant 0 : index
    %c0_10 = arith.constant 0 : index
    %c0_11 = arith.constant 0 : index
    %9 = vector.load %arg3[%c0_9, %c0_10, %c0_11] : memref<1x16x20xf32, #tpu.memory_space<vmem>>, vector<1x16x2xf32>
    tpu.vector_store %arg3[%c0_9, %c0_10, %c0_11], %8 {strides = array<i32>} : memref<1x16x20xf32, #tpu.memory_space<vmem>>, vector<1x16x2xf32>,
    %c0_12 = arith.constant 0 : index
    %c0_13 = arith.constant 0 : index
    %c18 = arith.constant 18 : index
    %10 = vector.load %arg3[%c0_12, %c0_13, %c18] : memref<1x16x20xf32, #tpu.memory_space<vmem>>, vector<1x16x2xf32>
    tpu.vector_store %arg3[%c0_12, %c0_13, %c18], %8 {strides = array<i32>} : memref<1x16x20xf32, #tpu.memory_space<vmem>>, vector<1x16x2xf32>,
    %c0_14 = arith.constant 0 : index
    %c0_15 = arith.constant 0 : index
    %c2_16 = arith.constant 2 : index
    %11 = vector.load %arg3[%c0_14, %c0_15, %c2_16] : memref<1x16x20xf32, #tpu.memory_space<vmem>>, vector<1x16x16xf32>
    tpu.vector_store %arg3[%c0_14, %c0_15, %c2_16], %7 {strides = array<i32>} : memref<1x16x20xf32, #tpu.memory_space<vmem>>, vector<1x16x16xf32>,
    %c0_17 = arith.constant 0 : index
    %c0_18 = arith.constant 0 : index
    %c0_19 = arith.constant 0 : index
    %12 = vector.load %arg3[%c0_17, %c0_18, %c0_19] : memref<1x16x20xf32, #tpu.memory_space<vmem>>, vector<1x16x16xf32>
    %c0_20 = arith.constant 0 : index
    %c0_21 = arith.constant 0 : index
    %c1_22 = arith.constant 1 : index
    %13 = vector.load %arg3[%c0_20, %c0_21, %c1_22] : memref<1x16x20xf32, #tpu.memory_space<vmem>>, vector<1x16x16xf32>
    %c0_23 = arith.constant 0 : index
    %c0_24 = arith.constant 0 : index
    %c2_25 = arith.constant 2 : index
    %14 = vector.load %arg3[%c0_23, %c0_24, %c2_25] : memref<1x16x20xf32, #tpu.memory_space<vmem>>, vector<1x16x16xf32>
    %c0_26 = arith.constant 0 : index
    %c0_27 = arith.constant 0 : index
    %c3 = arith.constant 3 : index
    %15 = vector.load %arg3[%c0_26, %c0_27, %c3] : memref<1x16x20xf32, #tpu.memory_space<vmem>>, vector<1x16x16xf32>
    %c0_28 = arith.constant 0 : index
    %c0_29 = arith.constant 0 : index
    %c4 = arith.constant 4 : index
    %16 = vector.load %arg3[%c0_28, %c0_29, %c4] : memref<1x16x20xf32, #tpu.memory_space<vmem>>, vector<1x16x16xf32>
    %17 = arith.addf %14, %14 : vector<1x16x16xf32>
    %18 = arith.addf %13, %15 : vector<1x16x16xf32>
    %19 = arith.subf %18, %17 : vector<1x16x16xf32>
    %20 = arith.addf %12, %16 : vector<1x16x16xf32>
    %21 = arith.subf %20, %17 : vector<1x16x16xf32>
    %cst_30 = arith.constant 0.000000e+00 : f32
    %22 = vector.broadcast %cst_30 : f32 to vector<1x2x16xf32>
    %c0_31 = arith.constant 0 : index
    %c0_32 = arith.constant 0 : index
    %c0_33 = arith.constant 0 : index
    %23 = vector.load %arg4[%c0_31, %c0_32, %c0_33] : memref<1x20x16xf32, #tpu.memory_space<vmem>>, vector<1x2x16xf32>
    tpu.vector_store %arg4[%c0_31, %c0_32, %c0_33], %22 {strides = array<i32>} : memref<1x20x16xf32, #tpu.memory_space<vmem>>, vector<1x2x16xf32>,
    %c0_34 = arith.constant 0 : index
    %c18_35 = arith.constant 18 : index
    %c0_36 = arith.constant 0 : index
    %24 = vector.load %arg4[%c0_34, %c18_35, %c0_36] : memref<1x20x16xf32, #tpu.memory_space<vmem>>, vector<1x2x16xf32>
    tpu.vector_store %arg4[%c0_34, %c18_35, %c0_36], %22 {strides = array<i32>} : memref<1x20x16xf32, #tpu.memory_space<vmem>>, vector<1x2x16xf32>,
    %c0_37 = arith.constant 0 : index
    %c2_38 = arith.constant 2 : index
    %c0_39 = arith.constant 0 : index
    %25 = vector.load %arg4[%c0_37, %c2_38, %c0_39] : memref<1x20x16xf32, #tpu.memory_space<vmem>>, vector<1x16x16xf32>
    tpu.vector_store %arg4[%c0_37, %c2_38, %c0_39], %19 {strides = array<i32>} : memref<1x20x16xf32, #tpu.memory_space<vmem>>, vector<1x16x16xf32>,
    %c0_40 = arith.constant 0 : index
    %c0_41 = arith.constant 0 : index
    %c0_42 = arith.constant 0 : index
    %26 = vector.load %arg5[%c0_40, %c0_41, %c0_42] : memref<1x20x16xf32, #tpu.memory_space<vmem>>, vector<1x2x16xf32>
    tpu.vector_store %arg5[%c0_40, %c0_41, %c0_42], %22 {strides = array<i32>} : memref<1x20x16xf32, #tpu.memory_space<vmem>>, vector<1x2x16xf32>,
    %c0_43 = arith.constant 0 : index
    %c18_44 = arith.constant 18 : index
    %c0_45 = arith.constant 0 : index
    %27 = vector.load %arg5[%c0_43, %c18_44, %c0_45] : memref<1x20x16xf32, #tpu.memory_space<vmem>>, vector<1x2x16xf32>
    tpu.vector_store %arg5[%c0_43, %c18_44, %c0_45], %22 {strides = array<i32>} : memref<1x20x16xf32, #tpu.memory_space<vmem>>, vector<1x2x16xf32>,
    %c0_46 = arith.constant 0 : index
    %c2_47 = arith.constant 2 : index
    %c0_48 = arith.constant 0 : index
    %28 = vector.load %arg5[%c0_46, %c2_47, %c0_48] : memref<1x20x16xf32, #tpu.memory_space<vmem>>, vector<1x16x16xf32>
    tpu.vector_store %arg5[%c0_46, %c2_47, %c0_48], %21 {strides = array<i32>} : memref<1x20x16xf32, #tpu.memory_space<vmem>>, vector<1x16x16xf32>,
    %c0_49 = arith.constant 0 : index
    %c0_50 = arith.constant 0 : index
    %c0_51 = arith.constant 0 : index
    %29 = vector.load %arg4[%c0_49, %c0_50, %c0_51] : memref<1x20x16xf32, #tpu.memory_space<vmem>>, vector<1x16x16xf32>
    %c0_52 = arith.constant 0 : index
    %c1_53 = arith.constant 1 : index
    %c0_54 = arith.constant 0 : index
    %30 = vector.load %arg4[%c0_52, %c1_53, %c0_54] : memref<1x20x16xf32, #tpu.memory_space<vmem>>, vector<1x16x16xf32>
    %c0_55 = arith.constant 0 : index
    %c2_56 = arith.constant 2 : index
    %c0_57 = arith.constant 0 : index
    %31 = vector.load %arg4[%c0_55, %c2_56, %c0_57] : memref<1x20x16xf32, #tpu.memory_space<vmem>>, vector<1x16x16xf32>
    %c0_58 = arith.constant 0 : index
    %c3_59 = arith.constant 3 : index
    %c0_60 = arith.constant 0 : index
    %32 = vector.load %arg4[%c0_58, %c3_59, %c0_60] : memref<1x20x16xf32, #tpu.memory_space<vmem>>, vector<1x16x16xf32>
    %c0_61 = arith.constant 0 : index
    %c4_62 = arith.constant 4 : index
    %c0_63 = arith.constant 0 : index
    %33 = vector.load %arg4[%c0_61, %c4_62, %c0_63] : memref<1x20x16xf32, #tpu.memory_space<vmem>>, vector<1x16x16xf32>
    %c0_64 = arith.constant 0 : index
    %c0_65 = arith.constant 0 : index
    %c0_66 = arith.constant 0 : index
    %34 = vector.load %arg5[%c0_64, %c0_65, %c0_66] : memref<1x20x16xf32, #tpu.memory_space<vmem>>, vector<1x16x16xf32>
    %c0_67 = arith.constant 0 : index
    %c1_68 = arith.constant 1 : index
    %c0_69 = arith.constant 0 : index
    %35 = vector.load %arg5[%c0_67, %c1_68, %c0_69] : memref<1x20x16xf32, #tpu.memory_space<vmem>>, vector<1x16x16xf32>
    %c0_70 = arith.constant 0 : index
    %c2_71 = arith.constant 2 : index
    %c0_72 = arith.constant 0 : index
    %36 = vector.load %arg5[%c0_70, %c2_71, %c0_72] : memref<1x20x16xf32, #tpu.memory_space<vmem>>, vector<1x16x16xf32>
    %c0_73 = arith.constant 0 : index
    %c3_74 = arith.constant 3 : index
    %c0_75 = arith.constant 0 : index
    %37 = vector.load %arg5[%c0_73, %c3_74, %c0_75] : memref<1x20x16xf32, #tpu.memory_space<vmem>>, vector<1x16x16xf32>
    %c0_76 = arith.constant 0 : index
    %c4_77 = arith.constant 4 : index
    %c0_78 = arith.constant 0 : index
    %38 = vector.load %arg5[%c0_76, %c4_77, %c0_78] : memref<1x20x16xf32, #tpu.memory_space<vmem>>, vector<1x16x16xf32>
    %39 = arith.addf %30, %32 : vector<1x16x16xf32>
    %40 = arith.addf %29, %33 : vector<1x16x16xf32>
    %41 = arith.addf %35, %37 : vector<1x16x16xf32>
    %42 = arith.addf %34, %38 : vector<1x16x16xf32>
    %43 = arith.addf %31, %31 : vector<1x16x16xf32>
    %44 = arith.subf %39, %43 : vector<1x16x16xf32>
    %cst_79 = arith.constant 2.000000e+00 : f32
    %45 = vector.broadcast %cst_79 : f32 to vector<1x16x16xf32>
    %46 = arith.mulf %45, %40 : vector<1x16x16xf32>
    %cst_80 = arith.constant 6.000000e+00 : f32
    %47 = vector.broadcast %cst_80 : f32 to vector<1x16x16xf32>
    %48 = arith.mulf %47, %39 : vector<1x16x16xf32>
    %49 = arith.subf %46, %48 : vector<1x16x16xf32>
    %cst_81 = arith.constant 8.000000e+00 : f32
    %50 = vector.broadcast %cst_81 : f32 to vector<1x16x16xf32>
    %51 = arith.mulf %50, %31 : vector<1x16x16xf32>
    %52 = arith.addf %49, %51 : vector<1x16x16xf32>
    %cst_82 = arith.constant 2.000000e+00 : f32
    %53 = vector.broadcast %cst_82 : f32 to vector<1x16x16xf32>
    %54 = arith.mulf %53, %41 : vector<1x16x16xf32>
    %55 = arith.subf %54, %42 : vector<1x16x16xf32>
    %56 = arith.addf %36, %36 : vector<1x16x16xf32>
    %57 = arith.subf %55, %56 : vector<1x16x16xf32>
    %58 = arith.addf %52, %57 : vector<1x16x16xf32>
    %cst_83 = arith.constant -2.500000e-01 : f32
    %59 = vector.broadcast %cst_83 : f32 to vector<1x16x16xf32>
    %60 = arith.mulf %44, %59 : vector<1x16x16xf32>
    %cst_84 = arith.constant -3.000000e+00 : f32
    %cst_85 = arith.constant 3.000000e+00 : f32
    %61 = vector.broadcast %cst_84 : f32 to vector<1x16x16xf32>
    %62 = arith.maximumf %61, %60 : vector<1x16x16xf32>
    %63 = vector.broadcast %cst_85 : f32 to vector<1x16x16xf32>
    %64 = arith.minimumf %63, %62 : vector<1x16x16xf32>
    %c0_86 = arith.constant 0 : index
    %c0_87 = arith.constant 0 : index
    %c0_88 = arith.constant 0 : index
    %c0_89 = arith.constant 0 : index
    %65 = vector.load %arg2[%c0_86, %c0_87, %c0_88, %c0_89] : memref<1x3x16x16xf32, #tpu.memory_space<vmem>>, vector<1x1x16x16xf32>
    %66 = vector.shape_cast %65 : vector<1x1x16x16xf32> to vector<1x16x16xf32>
    %67 = vector.shape_cast %64 : vector<1x16x16xf32> to vector<1x1x16x16xf32>
    tpu.vector_store %arg2[%c0_86, %c0_87, %c0_88, %c0_89], %67 {strides = array<i32>} : memref<1x3x16x16xf32, #tpu.memory_space<vmem>>, vector<1x1x16x16xf32>,
    %cst_90 = arith.constant 0.0833333358 : f32
    %68 = vector.broadcast %cst_90 : f32 to vector<1x16x16xf32>
    %69 = arith.mulf %58, %68 : vector<1x16x16xf32>
    %cst_91 = arith.constant -3.000000e+00 : f32
    %cst_92 = arith.constant 3.000000e+00 : f32
    %70 = vector.broadcast %cst_91 : f32 to vector<1x16x16xf32>
    %71 = arith.maximumf %70, %69 : vector<1x16x16xf32>
    %72 = vector.broadcast %cst_92 : f32 to vector<1x16x16xf32>
    %73 = arith.minimumf %72, %71 : vector<1x16x16xf32>
    %c0_93 = arith.constant 0 : index
    %c1_94 = arith.constant 1 : index
    %c0_95 = arith.constant 0 : index
    %c0_96 = arith.constant 0 : index
    %74 = vector.load %arg2[%c0_93, %c1_94, %c0_95, %c0_96] : memref<1x3x16x16xf32, #tpu.memory_space<vmem>>, vector<1x1x16x16xf32>
    %75 = vector.shape_cast %74 : vector<1x1x16x16xf32> to vector<1x16x16xf32>
    %76 = vector.shape_cast %73 : vector<1x16x16xf32> to vector<1x1x16x16xf32>
    tpu.vector_store %arg2[%c0_93, %c1_94, %c0_95, %c0_96], %76 {strides = array<i32>} : memref<1x3x16x16xf32, #tpu.memory_space<vmem>>, vector<1x1x16x16xf32>,
    %cst_97 = arith.constant 5.000000e-01 : f32
    %77 = vector.broadcast %cst_97 : f32 to vector<1x16x16xf32>
    %78 = arith.mulf %31, %77 : vector<1x16x16xf32>
    %cst_98 = arith.constant -3.000000e+00 : f32
    %cst_99 = arith.constant 3.000000e+00 : f32
    %79 = vector.broadcast %cst_98 : f32 to vector<1x16x16xf32>
    %80 = arith.maximumf %79, %78 : vector<1x16x16xf32>
    %81 = vector.broadcast %cst_99 : f32 to vector<1x16x16xf32>
    %82 = arith.minimumf %81, %80 : vector<1x16x16xf32>
    %c0_100 = arith.constant 0 : index
    %c2_101 = arith.constant 2 : index
    %c0_102 = arith.constant 0 : index
    %c0_103 = arith.constant 0 : index
    %83 = vector.load %arg2[%c0_100, %c2_101, %c0_102, %c0_103] : memref<1x3x16x16xf32, #tpu.memory_space<vmem>>, vector<1x1x16x16xf32>
    %84 = vector.shape_cast %83 : vector<1x1x16x16xf32> to vector<1x16x16xf32>
    %85 = vector.shape_cast %82 : vector<1x16x16xf32> to vector<1x1x16x16xf32>
    tpu.vector_store %arg2[%c0_100, %c2_101, %c0_102, %c0_103], %85 {strides = array<i32>} : memref<1x3x16x16xf32, #tpu.memory_space<vmem>>, vector<1x1x16x16xf32>,
    return
  }
  func.func @transform_0(%arg0: i32) -> (i32, i32, i32, i32) {
    %c0_i32 = arith.constant 0 : i32
    %c0_i32_0 = arith.constant 0 : i32
    %c0_i32_1 = arith.constant 0 : i32
    %c0_i32_2 = arith.constant 0 : i32
    return %arg0, %c0_i32, %c0_i32_0, %c0_i32_1 : i32, i32, i32, i32
  }
  func.func @transform_1(%arg0: i32) -> (i32, i32, i32, i32) {
    %c0_i32 = arith.constant 0 : i32
    %c0_i32_0 = arith.constant 0 : i32
    %c0_i32_1 = arith.constant 0 : i32
    %c0_i32_2 = arith.constant 0 : i32
    return %arg0, %c0_i32, %c0_i32_0, %c0_i32_1 : i32, i32, i32, i32
  }
}

</mosaic_0001>

<bundles_post_ra>
// kernel: tpu_custom_call.1
= control target key start
LH: loop header
LB: loop body
LE: loop exit
PB: predicated region body
PF: predicated region fallthrough
CT: control target
= control target key end

     0   :  { %6 = vsyncpa [#allocation6], 0  ;;  %s754_s0 = inlined_call_operand.hbm [shape: f32[2,3,16,16], index: 0, kind: input, shape index: {}]   ;;  %s755_s1 = inlined_call_operand.hbm [shape: f32[2,3,16,16], index: 1, kind: output, shape index: {}]  }
   0x1   :  { %8 = vsyncpa [#allocation6 + $0x1], 0 }
   0x2   :  { %9 = vsyncpa [#allocation7], 0 }
   0x3   :  { %11 = vsyncpa [#allocation7 + $0x1], 0  ;;  %s583_s6 = smov 0   ;;  %s585_s7 = smov 0  }
   0x4   :  { %s587_s8 = smov 0   ;;  %s589_s9 = smov 0  }
   0x5 LB: > { %s604_s10 = sadd.s32 4294967295, %s560_s9   ;;  %s387_s11 = sadd.s32 4294967294, %s560_s9   ;;  %s560_s9 = sphi %s589_s9, %s769_s9   ;;  %s556_s8 = sphi %s587_s8, %s768_s8   ;;  %s552_s7 = sphi %s585_s7, %s767_s7   ;;  %s548_s6 = sphi %s583_s6, %s766_s6  }
   0x6   : > { %s608_s12 = sadd.s32 1, %s560_s9   ;;  %s24_s13 = sadd.s32 1, %s556_s8 }
   0x7   : > { %s21_s14 = ssub.s32 %s560_s9, %s608_s12  ;;  %p31_p0 = scmp.ne.s32.totalorder %s556_s8, %s552_s7 }
   0x8   : > { %p22_p1 = scmp.eq.s32.totalorder %s21_s14, 0  ;;  %p32_p2 = scmp.eq.s32.totalorder %s560_s9, 0 }
   0x9   : > { %p37_p3 = scmp.ne.s32.totalorder %s552_s7, %s548_s6  ;;  %p38_p4 = scmp.eq.s32.totalorder %s604_s10, 0 }
   0xa   : > { %s620_s15 = scalar_select %p22_p1, %s556_s8, %s24_s13  }
   0xb   : > { %p33_p5 = por %p32_p2, %p31_p0  ;;  %p622_p6 = por %p38_p4, %p37_p3 }
   0xc   : > { %p61_p7 = scmp.eq.s32.totalorder %s604_s10, 1  ;;  %p67_p8 = scmp.eq.s32.totalorder %s387_s11, 1 }
   0xd   : > { %s758_s16 = scalar_select %p622_p6, 1, 0 }
   0xe   : > { %p425_p10 = scmp.lt.s32.totalorder %s560_s9, 2  ;;  %p629_p11 = por %p61_p7, %p31_p0 }
   0xf   : > { %p633_p12 = por %p67_p8, %p37_p3  ;;  %s87_s19 = sand.u32 1, %s556_s8  }
  0x10   : > { %s759_s17 = scalar_select %p629_p11, 1, 0 }
  0x11   : > { %s760_s18 = scalar_select %p633_p12, 1, 0 }
  0x12   : > { %s410_s20 = smul.u32 768, %s560_s9  ;;  %p644_p13 = pnand %p425_p10, %p33_p5 }
  0x13   : > { %s409_s21 = smul.u32 48, %s87_s19  ;;  %s650_s28 = scalar_lea.sflag [#allocation6], %s87_s19 }
  0x14   : > { %s642_s24 = scalar_lea.hbm %s754_s0, %s410_s20  ;;  %p470_p1 = pneg %p644_p13 }
  0x15   : > { %s91_s26 = scalar_lea.vmem [#allocation5], %s409_s21  ;;  %s468_s29 = scalar_lea.hbm %s642_s24, 768 }
  0x16   : > { %s98_s27 = sshll.u32 %s91_s26, 4  ;;  %p469_p0 = scmp.ne.s32.totalorder %s642_s24, %s468_s29  ;;  %s648_s27 = int_to_ptr.vmem [resolvable:$true] %s98_s27 }
  0x17   : > { %s473_s3 = scalar_lea.hbm %s754_s0, 1536  ;;  %p474_p4 = scmp.lt.s32.totalorder %s642_s24, %s754_s0 }
  0x18   : > { %p471_p2 = pnand %p470_p1, %p469_p0  ;;  %p475_p5 = scmp.lt.s32.totalorder %s473_s3, %s468_s29 }
  0x1a   : > { %p472_p3 = pneg %p471_p2  ;;  %p476_p7 = por %p475_p5, %p474_p4 }
  0x1c   : > { %p477_p8 = pnand %p476_p7, %p472_p3 }
  0x1e   : > { %480 = shalt.err (!%p477_p8)
}
  0x1f   : > { %s481_s11 = scalar_lea.vmem %s648_s27, 768  ;;  %s562_s13 = smov [#allocation5]  }
  0x20   : > { %p482_p10 = scmp.ne.s32.totalorder %s648_s27, %s481_s11  ;;  %s486_s14 = sshll.u32 %s562_s13, 4  ;;  %s487_s14 = int_to_ptr.vmem [resolvable:$false] %s486_s14 }
  0x21   : > { %s488_s19 = scalar_lea.vmem %s487_s14, 1536  ;;  %p489_p2 = scmp.lt.s32.totalorder %s648_s27, %s487_s14 }
  0x22   : > { %p484_p9 = pnand %p482_p10, %p470_p1  ;;  %p490_p12 = scmp.lt.s32.totalorder %s488_s19, %s481_s11 }
  0x24   : > { %p485_p0 = pneg %p484_p9  ;;  %p491_p11 = por %p490_p12, %p489_p2 }
  0x26   : > { %p492_p6 = pnand %p491_p11, %p485_p0 }
  0x28   : > { %495 = shalt.err (!%p492_p6)
}
  0x29   : > { %s563_s20 = smov 128   ;;  %s564_s21 = smov 8  }
  0x2a   : > { %420 = dma.hbm_to_vmem [thread:$0]  (!%p644_p13), %s642_s24, 768, %s648_s27, %s650_s28, %s563_s20, %s563_s20, %s564_s21  }
  0x2b   : > { %p391_p9 = scmp.ge.s32.totalorder %s560_s9, 1  ;;  %p106_p1 = scmp.lt.s32.totalorder %s560_s9, 3 }
  0x2d   : > { %p107_p3 = pnand %p391_p9, %p106_p1 }
  0x2e   : > { %s674_s22 = sand.u32 (!%p107_p3), 1, %s552_s7   ;;  %p762_p6 = scmp.ne.s32.totalorder (!%p107_p3), %s758_s16, 0 }
  0x2f   : > { %110 = sbr.rel (%p107_p3) target bundleno = 462 (0x1ce), region = 24  ;;  %s113_s26 = scalar_lea.sflag (!%p107_p3), [#allocation6], %s674_s22 }
  0x30   : > { %s411_s23 = smul.u32 (!%p107_p3), 48, %s674_s22 }
  0x32   : > { %s116_s29 = scalar_lea.vmem (!%p107_p3), [#allocation5], %s411_s23 }
  0x34   : > { %539 = dma.done.wait (%p762_p6), %s113_s26, 768  }
  0x35   : > { %541 = vsyncadd (%p762_p6), %s113_s26, 4294966528  ;;  %vm147_vm0 = vcmask 15360   ;;  %vm150_vm1 = vcmask 162960   ;;  %v565_v0 = vmov 0.0   ;;  %vm204_vm2 = vcmask 123904   ;;  %v135_v1 = vld [vmem:[%s116_s29] sm:$0xff] }
  0x36   : > { %148 = vst.msk [vmem:[#allocation2] sm:$0xff] %vm147_vm0, %v565_v0  ;;  %149 = vst.msk [vmem:[#allocation2 + $0x8] sm:$0xff] %vm147_vm0, %v565_v0  ;;  %v392_v2 = vld [vmem:[%s116_s29 + $0x10] sm:$0xff]  ;;  %v394_v3 = vld [vmem:[%s116_s29 + $0x20] sm:$0xff]  ;;  %s566_s16 = smov 2   ;;  %vm161_vm3 = vcmask 146448  }
  0x37   : > { %151 = vst.msk [vmem:[#allocation2] sm:$0xff] %vm150_vm1, %v565_v0  ;;  %152 = vst.msk [vmem:[#allocation2 + $0x8] sm:$0xff] %vm150_vm1, %v565_v0  ;;  %v140_v4 = vadd.f32 %v392_v2, %v135_v1  ;;  %v136_v5 = vld [vmem:[%s116_s29 + $0x8] sm:$0xff]  ;;  %v393_v6 = vld [vmem:[%s116_s29 + $0x18] sm:$0xff]  ;;  %s567_s24 = smov 126   ;;  %s568_s25 = smov 127  }
  0x38   : > { %205 = vst.msk [vmem:[#allocation3] sm:$0x3] %vm204_vm2, %v565_v0  ;;  %206 = vst.msk [vmem:[#allocation3 + $0x12] sm:$0x3] %vm204_vm2, %v565_v0  ;;  %v141_v7 = vadd.f32 %v393_v6, %v136_v5  ;;  %v395_v8 = vld [vmem:[%s116_s29 + $0x28] sm:$0xff]  ;;  %s569_s27 = smov 124  }
  0x39   : > { %218 = vst.msk [vmem:[#allocation4] sm:$0x3] %vm204_vm2, %v565_v0  ;;  %219 = vst.msk [vmem:[#allocation4 + $0x12] sm:$0x3] %vm204_vm2, %v565_v0  ;;  %v145_v9 = vadd.f32 %v394_v3, %v140_v4  ;;  %vm215_vm4 = vcmask 130048   ;;  %s690_s28 = scalar_lea.vmem [#allocation8], %s411_s23 }
  0x3a   : > { %v146_v10 = vadd.f32 %v395_v8, %v141_v7  ;;  %s412_s30 = smul.u32 768, %s604_s10  ;;  %s314_s2 = sshll.u32 %s690_s28, 4  ;;  %s707_s2 = int_to_ptr.vmem [resolvable:$true] %s314_s2 }
  0x3b   : > { %155 = vrot.lane.b32.xlu0 %v145_v9, %s566_s16  ;;  %s301_s10 = scalar_lea.sflag [#allocation7], %s674_s22  ;;  %s496_s11 = scalar_lea.vmem %s707_s2, 768 }
  0x3c   : > { %s705_s5 = scalar_lea.hbm %s755_s1, %s412_s30  ;;  %p497_p11 = scmp.ne.s32.totalorder %s707_s2, %s496_s11 }
  0x3d   : > { %p763_p12 = scmp.ne.s32.totalorder %s759_s17, 0  ;;  %s570_s13 = smov [#allocation8]  }
  0x3e   : > { %s500_s14 = sshll.u32 %s570_s13, 4  ;;  %s501_s14 = int_to_ptr.vmem [resolvable:$false] %s500_s14 }
  0x3f   : > { %157 = vrot.lane.b32.xlu0 %v146_v10, %s566_s16  ;;  %p498_p13 = pnand %p497_p11, %p763_p12  ;;  %s502_s19 = scalar_lea.vmem %s501_s14, 1536 }
  0x40   : > { %p503_p5 = scmp.lt.s32.totalorder %s707_s2, %s501_s14  ;;  %p504_p7 = scmp.lt.s32.totalorder %s502_s19, %s496_s11 }
  0x41   : > { %p499_p4 = pneg %p498_p13 }
  0x42   : > { %p505_p8 = por %p504_p7, %p503_p5 }
  0x44   : > { %p506_p10 = pnand %p505_p8, %p499_p4 }
  0xad   : > { %v156_v11 = vpop.permute.xlu0 %155 }
  0xae   : > { %162 = vst.msk [vmem:[#allocation2] sm:$0xff] %vm161_vm3, %v156_v11 }
  0xb1   : > { %v158_v12 = vpop.permute.xlu0 %157 }
  0xb2   : > { %163 = vst.msk [vmem:[#allocation2 + $0x8] sm:$0xff] %vm161_vm3, %v158_v12 }
  0xb5   : > { %v164_v13 = vld [vmem:[#allocation2] sm:$0xff] }
  0xb6   : > { %170 = vrot.lane.b32.xlu1 %v164_v13, %s567_s24  ;;  %v166_v14 = vadd.f32 %v164_v13, %v164_v13 }
  0xb8   : > { %180 = vrot.lane.b32.xlu0 %v166_v14, %s568_s25 }
  0xb9   : > { %v165_v15 = vld [vmem:[#allocation2 + $0x8] sm:$0xff] }
  0xba   : > { %172 = vrot.lane.b32.xlu1 %v165_v15, %s567_s24  ;;  %v167_v16 = vadd.f32 %v165_v15, %v165_v15 }
  0xbc   : > { %188 = vrot.lane.b32.xlu0 %v164_v13, %s569_s27 }
  0xbe   : > { %182 = vrot.lane.b32.xlu1 %v167_v16, %s568_s25 }
  0xc0   : > { %196 = vrot.lane.b32.xlu0 %v166_v14, %s567_s24 }
  0xc2   : > { %190 = vrot.lane.b32.xlu1 %v165_v15, %s569_s27 }
  0xc6   : > { %198 = vrot.lane.b32.xlu1 %v167_v16, %s567_s24 }
 0x128   : > { %v171_v17 = vpop.permute.xlu1 %170 }
 0x129   : > { %v176_v18 = vadd.f32 %v171_v17, %v164_v13 }
 0x12a   : > { %v181_v19 = vpop.permute.xlu0 %180 }
 0x12b   : > { %v186_v20 = vsub.f32 %v176_v18, %v181_v19 }
 0x12c   : > { %v173_v21 = vpop.permute.xlu1 %172 }
 0x12d   : > { %209 = vrot.lane.b32.xlu0 %v186_v20, %s568_s25  ;;  %v177_v23 = vadd.f32 %v173_v21, %v165_v15 }
 0x12e   : > { %v189_v22 = vpop.permute.xlu0 %188 }
 0x12f   : > { %v194_v25 = vadd.f32 %v189_v22, %v164_v13 }
 0x130   : > { %v183_v24 = vpop.permute.xlu1 %182 }
 0x131   : > { %v187_v26 = vsub.f32 %v177_v23, %v183_v24 }
 0x132   : > { %v197_v27 = vpop.permute.xlu0 %196 }
 0x133   : > { %v202_v28 = vsub.f32 %v194_v25, %v197_v27  ;;  %211 = vrot.lane.b32.xlu1 %v187_v26, %s568_s25 }
 0x134   : > { %v191_v29 = vpop.permute.xlu1 %190 }
 0x135   : > { %220 = vst.msk [vmem:[#allocation4 + $0x2] sm:$0xff] %vm215_vm4, %v202_v28  ;;  %v195_v30 = vadd.f32 %v191_v29, %v165_v15 }
 0x138   : > { %v199_v31 = vpop.permute.xlu1 %198 }
 0x139   : > { %v203_v32 = vsub.f32 %v195_v30, %v199_v31 }
 0x13b   : > { %221 = vst.msk [vmem:[#allocation4 + $0xa] sm:$0xff] %vm215_vm4, %v203_v32 }
 0x13c   : > { %v234_v36 = vld [vmem:[#allocation4 + $0x1] sm:$0xff] }
 0x13d   : > { %v232_v44 = vld [vmem:[#allocation4] sm:$0xff] }
 0x13e   : > { %v236_v61 = vld [vmem:[#allocation4 + $0x2] sm:$0xff] }
 0x13f   : > { %v268_v12 = vadd.f32 %v236_v61, %v236_v61 }
 0x142   : > { %v238_v34 = vld [vmem:[#allocation4 + $0x3] sm:$0xff]  ;;  %v239_v38 = vld [vmem:[#allocation4 + $0xb] sm:$0xff] }
 0x143   : > { %v235_v37 = vld [vmem:[#allocation4 + $0x9] sm:$0xff]  ;;  %v246_v40 = vadd.f32 %v238_v34, %v234_v36 }
 0x144   : > { %v247_v42 = vadd.f32 %v239_v38, %v235_v37  ;;  %v233_v45 = vld [vmem:[#allocation4 + $0x8] sm:$0xff] }
 0x145   : > { %v240_v46 = vld [vmem:[#allocation4 + $0x4] sm:$0xff]  ;;  %v241_v47 = vld [vmem:[#allocation4 + $0xc] sm:$0xff]  ;;  %v264_v48 = vmul.f32 2.0, %v246_v40 }
 0x146   : > { %v248_v54 = vadd.f32 %v240_v46, %v232_v44  ;;  %v265_v55 = vmul.f32 2.0, %v247_v42  ;;  %v249_v3 = vadd.f32 %v241_v47, %v233_v45  ;;  %v237_v7 = vld [vmem:[#allocation4 + $0xa] sm:$0xff] }
 0x147   : > { %v269_v20 = vadd.f32 %v237_v7, %v237_v7 }
 0x148   : > { %v266_v4 = vsub.f32 %v264_v48, %v248_v54  ;;  %v267_v13 = vsub.f32 %v265_v55, %v249_v3 }
 0x14a   : > { %v270_v23 = vsub.f32 %v266_v4, %v268_v12  ;;  %v271_v27 = vsub.f32 %v267_v13, %v269_v20 }
 0x19f   : > { %v210_v33 = vpop.permute.xlu0 %209 }
 0x1a0   : > { %216 = vst.msk [vmem:[#allocation3 + $0x2] sm:$0xff] %vm215_vm4, %v210_v33 }
 0x1a5   : > { %v212_v35 = vpop.permute.xlu1 %211 }
 0x1a6   : > { %217 = vst.msk [vmem:[#allocation3 + $0xa] sm:$0xff] %vm215_vm4, %v212_v35 }
 0x1a7   : > { %v226_v39 = vld [vmem:[#allocation3 + $0x2] sm:$0xff] }
 0x1a8   : > { %v291_v41 = vmul.f32 0.5, %v226_v39  ;;  %v222_v49 = vld [vmem:[#allocation3] sm:$0xff]  ;;  %v250_v62 = vadd.f32 %v226_v39, %v226_v39  ;;  %v260_v16 = vmul.f32 8.0, %v226_v39 }
 0x1a9   : > { %v224_v50 = vld [vmem:[#allocation3 + $0x1] sm:$0xff] }
 0x1aa   : > { %v402_v43 = vclamps-f32 %v291_v41, 3.0 }
 0x1ac   : > { %404 = vst.msk [vmem:[%s690_s28 + $0x20] sm:$0xff] %vm215_vm4, %v402_v43 }
 0x1ad   : > { %v223_v51 = vld [vmem:[#allocation3 + $0x8] sm:$0xff] }
 0x1ae   : > { %v225_v52 = vld [vmem:[#allocation3 + $0x9] sm:$0xff] }
 0x1af   : > { %v227_v53 = vld [vmem:[#allocation3 + $0xa] sm:$0xff] }
 0x1b0   : > { %v228_v56 = vld [vmem:[#allocation3 + $0x3] sm:$0xff]  ;;  %v229_v57 = vld [vmem:[#allocation3 + $0xb] sm:$0xff]  ;;  %v251_v59 = vadd.f32 %v227_v53, %v227_v53  ;;  %v292_v60 = vmul.f32 0.5, %v227_v53  ;;  %v261_v22 = vmul.f32 8.0, %v227_v53 }
 0x1b1   : > { %v230_v58 = vld [vmem:[#allocation3 + $0x4] sm:$0xff]  ;;  %v231_v63 = vld [vmem:[#allocation3 + $0xc] sm:$0xff]  ;;  %v242_v0 = vadd.f32 %v228_v56, %v224_v50  ;;  %v243_v1 = vadd.f32 %v229_v57, %v225_v52 }
 0x1b2   : > { %v244_v2 = vadd.f32 %v230_v58, %v222_v49  ;;  %v245_v5 = vadd.f32 %v231_v63, %v223_v51  ;;  %v403_v6 = vclamps-f32 %v292_v60, 3.0 }
 0x1b3   : > { %v252_v8 = vsub.f32 %v242_v0, %v250_v62  ;;  %v253_v9 = vsub.f32 %v243_v1, %v251_v59  ;;  %v256_v11 = vmul.f32 6.0, %v242_v0  ;;  %v257_v15 = vmul.f32 6.0, %v243_v1 }
 0x1b4   : > { %v254_v10 = vmul.f32 2.0, %v244_v2  ;;  %v255_v14 = vmul.f32 2.0, %v245_v5  ;;  %405 = vst.msk [vmem:[%s690_s28 + $0x28] sm:$0xff] %vm215_vm4, %v403_v6 }
 0x1b5   : > { %v274_v18 = vmul.f32 -0.25, %v252_v8  ;;  %v275_v19 = vmul.f32 -0.25, %v253_v9 }
 0x1b6   : > { %v258_v17 = vsub.f32 %v254_v10, %v256_v11  ;;  %v259_v21 = vsub.f32 %v255_v14, %v257_v15 }
 0x1b7   : > { %v396_v25 = vclamps-f32 %v274_v18, 3.0  ;;  %v397_v26 = vclamps-f32 %v275_v19, 3.0 }
 0x1b8   : > { %v262_v24 = vadd.f32 %v260_v16, %v258_v17  ;;  %v263_v28 = vadd.f32 %v261_v22, %v259_v21 }
 0x1b9   : > { %280 = vst.msk [vmem:[%s690_s28] sm:$0xff] %vm215_vm4, %v396_v25  ;;  %281 = vst.msk [vmem:[%s690_s28 + $0x8] sm:$0xff] %vm215_vm4, %v397_v26 }
 0x1ba   : > { %v272_v29 = vadd.f32 %v270_v23, %v262_v24  ;;  %v273_v30 = vadd.f32 %v271_v27, %v263_v28 }
 0x1bc   : > { %v282_v31 = vmul.f32 0.083333336, %v272_v29  ;;  %v283_v32 = vmul.f32 0.083333336, %v273_v30 }
 0x1be   : > { %v398_v33 = vclamps-f32 %v282_v31, 3.0  ;;  %v399_v34 = vclamps-f32 %v283_v32, 3.0 }
 0x1c0   : > { %400 = vst.msk [vmem:[%s690_s28 + $0x10] sm:$0xff] %vm215_vm4, %v398_v33  ;;  %401 = vst.msk [vmem:[%s690_s28 + $0x18] sm:$0xff] %vm215_vm4, %v399_v34 }
 0x1c1   : > { %509 = shalt.err (!%p506_p10)
}
 0x1c2   : > { %s510_s20 = scalar_lea.hbm %s705_s5, 768  ;;  %s514_s26 = scalar_lea.hbm %s755_s1, 1536 }
 0x1c3   : > { %p511_p0 = scmp.ne.s32.totalorder %s705_s5, %s510_s20  ;;  %p515_p1 = scmp.lt.s32.totalorder %s705_s5, %s755_s1 }
 0x1c4   : > { %p516_p3 = scmp.lt.s32.totalorder %s514_s26, %s510_s20 }
 0x1c5   : > { %p512_p2 = pnand %p511_p0, %p763_p12 }
 0x1c6   : > { %p517_p6 = por %p516_p3, %p515_p1 }
 0x1c7   : > { %p513_p9 = pneg %p512_p2 }
 0x1c9   : > { %p518_p11 = pnand %p517_p6, %p513_p9 }
 0x1cb   : > { %521 = shalt.err (!%p518_p11)
}
 0x1cc   : > { %s571_s24 = smov 128   ;;  %s572_s25 = smov 8  }
 0x1cd   : > { %415 = dma.vmem_to_hbm [thread:$0]  (%p763_p12), %s707_s2, 768, %s705_s5, %s301_s10, %s571_s24, %s571_s24, %s572_s25  }
 0x1ce PF: > { %s329_s27 = sand.u32 1, %s548_s6   ;;  %p764_p13 = scmp.ne.s32.totalorder %s760_s18, 0 }
 0x1cf   : > { %p765_p4 = scmp.ge.s32.totalorder %s560_s9, 2  ;;  %s330_s28 = scalar_lea.sflag [#allocation7], %s329_s27 }
 0x1d1   : > { %p422_p5 = pnand %p765_p4, %p764_p13 }
 0x1d3   : > { %p423_p7 = pneg %p422_p5 }
 0x1d5   : > { %543 = dma.done.wait (%p423_p7), %s330_s28, 768  }
 0x1d6   : > { %545 = vsyncadd (%p423_p7), %s330_s28, 4294966528  ;;  %p14_p8 = scmp.ge.s32.totalorder %s608_s12, 4   ;;  %s766_s6 = smov %s552_s7 }
 0x1d7   : > { %s767_s7 = smov %s556_s8  ;;  %s768_s8 = smov %s620_s15 }
 0x1d8   : > { %s769_s9 = smov %s608_s12  ;;  %16 = sbr.rel (!%p14_p8) target bundleno = 5 (0x5), region = 73 }
 0x1dd   :  { %335 = vsyncpa [#allocation6], 1 }
 0x1de   :  { %337 = vsyncpa [#allocation6 + $0x1], 1 }
 0x1df   :  { %338 = vsyncpa [#allocation7], 1 }
 0x1e0   :  { %340 = vsyncpa [#allocation7 + $0x1], 1 }

</bundles_post_ra>
